<compile_context>
chip_gen: v5e
topology: v5e:2x2
jax: 0.10.0
libtpu: 0.0.40
codegen_flags: <defaults>
</compile_context>

<pallas_src>
import jax
import jax.numpy as jnp
from jax.experimental import pallas as pl
from jax.experimental.pallas import tpu as pltpu


def _embed_kernel(x_ref, w_ref, pos_ref, o_ref):
    # x_ref:   (1, tm, K)   bf16 patch rows for one (batch, row-tile)
    # w_ref:   (K, H)       bf16 conv weight reshaped & transposed (resident)
    # pos_ref: (tm, H)      f32 position embedding + folded conv bias
    # o_ref:   (1, tm, H)   f32 output tile
    proj = jnp.dot(x_ref[0], w_ref[...],
                   preferred_element_type=jnp.float32)     # (tm, H), f32 accum
    o_ref[0] = (proj + pos_ref[...]).astype(o_ref.dtype)


def siglip_vision_embeddings(pixel_values, conv_w, conv_b, pos_emb, patch_size,
                             tm=256):
    """pixel_values: (B, C, H, W) float32 (NCHW, like PyTorch).
    conv_w: (hidden, C, P, P), conv_b: (hidden,), pos_emb: (N, hidden)."""
    B, C, H, W = pixel_values.shape
    P = patch_size
    hidden = conv_w.shape[0]
    nh, nw = H // P, W // P
    N = nh * nw
    K = C * P * P

    # Row tile: whole N if small, else 256 (multiple of 8 -> valid sublane block).
    tm = N if N <= tm else tm
    num_tiles = pl.cdiv(N, tm)

    # --- glue: patchify in bf16 (pure reshape/transpose, no compute) ---
    x = pixel_values.astype(jnp.bfloat16).reshape(B, C, nh, P, nw, P)
    x = jnp.transpose(x, (0, 2, 4, 1, 3, 5))       # (B, nh, nw, C, P, P)
    x_patches = x.reshape(B, N, K)                 # (B, N, K) bf16

    w2d = conv_w.reshape(hidden, K).T.astype(jnp.bfloat16)        # (K, hidden)
    # Fold conv bias into the position table (mathematically identical).
    pos_bias = (pos_emb + conv_b[None, :]).astype(jnp.float32)    # (N, hidden)

    # VMEM budget: double-buffered x/pos/out tiles + resident bf16 weight.
    working = 2 * (tm * K * 2           # x tile (bf16)
                   + K * hidden * 2     # weight (bf16)
                   + tm * hidden * 4    # pos tile (f32)
                   + tm * hidden * 4)   # out tile (f32)
    vmem_limit = int(min(max(working + (8 << 20), 32 << 20), 64 << 20))

    # NOTE: for tiny hidden (toy config hidden=32 < 128 lanes) the output store is
    # masked; real SigLIP hidden (768/1152) is already lane-dense so no repack here.
    out = pl.pallas_call(
        _embed_kernel,
        out_shape=jax.ShapeDtypeStruct((B, N, hidden), pixel_values.dtype),
        grid_spec=pltpu.PrefetchScalarGridSpec(
            num_scalar_prefetch=0,
            grid=(B, num_tiles),
            in_specs=[
                pl.BlockSpec((1, tm, K), lambda b, i: (b, i, 0)),
                pl.BlockSpec((K, hidden), lambda b, i: (0, 0)),
                pl.BlockSpec((tm, hidden), lambda b, i: (i, 0)),
            ],
            out_specs=pl.BlockSpec((1, tm, hidden), lambda b, i: (b, i, 0)),
        ),
        compiler_params=pltpu.CompilerParams(
            dimension_semantics=("parallel", "parallel"),
            vmem_limit_bytes=vmem_limit,
        ),
    )(x_patches, w2d, pos_bias)
    return out


def _reference(pixel_values, conv_w, conv_b, pos_emb, patch_size):
    # Pure-JAX f32 reference replicating the PyTorch forward exactly.
    patch_embeds = jax.lax.conv_general_dilated(
        pixel_values, conv_w,
        window_strides=(patch_size, patch_size),
        padding="VALID",
        dimension_numbers=("NCHW", "OIHW", "NCHW"),
    ) + conv_b[None, :, None, None]                 # (B, hidden, nh, nw)
    B, Hd, nh, nw = patch_embeds.shape
    emb = patch_embeds.reshape(B, Hd, nh * nw)      # flatten(2)
    emb = jnp.transpose(emb, (0, 2, 1))             # transpose(1, 2)
    emb = emb + pos_emb[None, :, :]                 # position_embedding(position_ids)
    return emb


if __name__ == "__main__":
    # Small config consistent with the module:
    # num_channels=4, image_size=16, patch_size=4, hidden_size=32
    batch, C, img, P, hidden = 2, 4, 16, 4, 32
    num_patches = (img // P) ** 2

    key = jax.random.PRNGKey(0)
    k1, k2, k3, k4 = jax.random.split(key, 4)
    pixel_values = jax.random.normal(k1, (batch, C, img, img), dtype=jnp.float32)
    conv_w = jax.random.normal(k2, (hidden, C, P, P), dtype=jnp.float32) * 0.05
    conv_b = jax.random.normal(k3, (hidden,), dtype=jnp.float32) * 0.05
    pos_emb = jax.random.normal(k4, (num_patches, hidden), dtype=jnp.float32) * 0.02

    out = siglip_vision_embeddings(pixel_values, conv_w, conv_b, pos_emb, P)
    out = jax.block_until_ready(out)

    ref = _reference(pixel_values, conv_w, conv_b, pos_emb, P)
    assert out.shape == (batch, num_patches, hidden)
    # Tolerance loosened vs v1: matmul operands are bf16 (f32 accumulation).
    assert jnp.allclose(out, ref, atol=2e-2, rtol=2e-2), "mismatch vs reference"

    print("KERNEL_OK")
</pallas_src>

<mosaic_0001>
module attributes {stable_mosaic.version = 11 : i64} {
  func.func @_embed_kernel(%arg0: i32, %arg1: i32, %arg2: memref<1x16x64xbf16, #tpu.memory_space<vmem>>, %arg3: memref<64x32xbf16, #tpu.memory_space<vmem>>, %arg4: memref<16x32xf32, #tpu.memory_space<vmem>>, %arg5: memref<1x16x32xf32, #tpu.memory_space<vmem>>) attributes {dimension_semantics = [#tpu.dimension_semantics<parallel>, #tpu.dimension_semantics<parallel>], iteration_bounds = array<i64: 2, 1>, scalar_prefetch = 0 : i64, scratch_operands = 0 : i64, tpu.core_type = #tpu.core_type<tc>, window_params = [{transform_indices = @transform_0, window_bounds = array<i64: 1, 16, 64>}, {pipeline_mode = #tpu.pipeline_mode<synchronous>, transform_indices = @transform_1, window_bounds = array<i64: 64, 32>}, {transform_indices = @transform_2, window_bounds = array<i64: 16, 32>}, {transform_indices = @transform_3, window_bounds = array<i64: 1, 16, 32>}]} {
    %c0 = arith.constant 0 : index
    %c0_0 = arith.constant 0 : index
    %c0_1 = arith.constant 0 : index
    %0 = vector.load %arg2[%c0, %c0_0, %c0_1] : memref<1x16x64xbf16, #tpu.memory_space<vmem>>, vector<1x16x64xbf16>
    %1 = vector.shape_cast %0 : vector<1x16x64xbf16> to vector<16x64xbf16>
    %c0_2 = arith.constant 0 : index
    %c0_3 = arith.constant 0 : index
    %2 = vector.load %arg3[%c0_2, %c0_3] : memref<64x32xbf16, #tpu.memory_space<vmem>>, vector<64x32xbf16>
    %cst = arith.constant dense<0.000000e+00> : vector<16x32xf32>
    %3 = tpu.matmul %1, %2, %cst {dimension_numbers = #tpu.dot_dimension_numbers<[1], [0], [0], [1], [0, 0, 1, 1], [], []>} : vector<16x64xbf16>, vector<64x32xbf16>, vector<16x32xf32> -> vector<16x32xf32>
    %c0_4 = arith.constant 0 : index
    %c0_5 = arith.constant 0 : index
    %4 = vector.load %arg4[%c0_4, %c0_5] : memref<16x32xf32, #tpu.memory_space<vmem>>, vector<16x32xf32>
    %5 = arith.addf %3, %4 : vector<16x32xf32>
    %c0_6 = arith.constant 0 : index
    %c0_7 = arith.constant 0 : index
    %c0_8 = arith.constant 0 : index
    %6 = vector.load %arg5[%c0_6, %c0_7, %c0_8] : memref<1x16x32xf32, #tpu.memory_space<vmem>>, vector<1x16x32xf32>
    %7 = vector.shape_cast %6 : vector<1x16x32xf32> to vector<16x32xf32>
    %8 = vector.shape_cast %5 : vector<16x32xf32> to vector<1x16x32xf32>
    tpu.vector_store %arg5[%c0_6, %c0_7, %c0_8], %8 {strides = array<i32>} : memref<1x16x32xf32, #tpu.memory_space<vmem>>, vector<1x16x32xf32>,
    return
  }
  func.func @transform_0(%arg0: i32, %arg1: i32) -> (i32, i32, i32) {
    %c0_i32 = arith.constant 0 : i32
    %c0_i32_0 = arith.constant 0 : i32
    return %arg0, %arg1, %c0_i32 : i32, i32, i32
  }
  func.func @transform_1(%arg0: i32, %arg1: i32) -> (i32, i32) {
    %c0_i32 = arith.constant 0 : i32
    %c0_i32_0 = arith.constant 0 : i32
    %c0_i32_1 = arith.constant 0 : i32
    return %c0_i32, %c0_i32_0 : i32, i32
  }
  func.func @transform_2(%arg0: i32, %arg1: i32) -> (i32, i32) {
    %c0_i32 = arith.constant 0 : i32
    %c0_i32_0 = arith.constant 0 : i32
    return %arg1, %c0_i32 : i32, i32
  }
  func.func @transform_3(%arg0: i32, %arg1: i32) -> (i32, i32, i32) {
    %c0_i32 = arith.constant 0 : i32
    %c0_i32_0 = arith.constant 0 : i32
    return %arg0, %arg1, %c0_i32 : i32, i32, i32
  }
}

</mosaic_0001>

<bundles_post_ra>
// kernel: tpu_custom_call.1
= control target key start
LH: loop header
LB: loop body
LE: loop exit
PB: predicated region body
PF: predicated region fallthrough
CT: control target
= control target key end

     0   :  { %8 = vsyncpa [#allocation3], 0  ;;  %s713_s0 = inlined_call_operand.vmem [shape: bf16[2,16,64], index: 0, kind: input, shape index: {}]   ;;  %s714_s1 = inlined_call_operand.vmem [shape: bf16[64,32], index: 1, kind: input, shape index: {}]   ;;  %s715_s2 = inlined_call_operand.vmem [shape: f32[16,32], index: 2, kind: input, shape index: {}]   ;;  %s716_s3 = inlined_call_operand.hbm [shape: f32[2,16,32], index: 3, kind: output, shape index: {}]  }
   0x1   :  { %10 = vsyncpa [#allocation3 + $0x1], 0  ;;  %s598_s12 = smov 0   ;;  %s600_s13 = smov 0  }
   0x2   :  { %s602_s14 = smov 0   ;;  %s604_s15 = smov 0  }
   0x3   :  { %s606_s16 = smov 0   ;;  %s608_s17 = smov 0  }
   0x4 LB: > { %s397_s18 = sadd.s32 4294967295, %s574_s17   ;;  %s398_s19 = sadd.s32 4294967294, %s574_s17   ;;  %s574_s17 = sphi %s608_s17, %s16_s17   ;;  %s570_s16 = sphi %s606_s16, %s723_s16   ;;  %s566_s15 = sphi %s604_s15, %s722_s15   ;;  %s562_s14 = sphi %s602_s14, %s721_s14   ;;  %s558_s13 = sphi %s600_s13, %s720_s13   ;;  %s554_s12 = sphi %s598_s12, %s719_s12  }
   0x5   : > { %s28_s20 = sadd.s32 1, %s570_s16  ;;  %s112_s21 = sadd.s32 1, %s562_s14 }
   0x6   : > { %p30_p0 = scmp.ge.s32.totalorder %s28_s20, 2  ;;  %p122_p1 = scmp.ne.s32.totalorder %s562_s14, %s558_s13 }
   0x7   : > { %p123_p2 = scmp.eq.s32.totalorder %s397_s18, 1  ;;  %p128_p3 = scmp.ne.s32.totalorder %s558_s13, %s554_s12 }
   0x8   : > { %s725_s20 = smov (%p30_p0, %s28_s20), 0  ;;  %p129_p5 = scmp.eq.s32.totalorder %s398_s19, 1 }
   0x9   : > { %p638_p4 = por %p123_p2, %p122_p1  ;;  %s107_s23 = ssub.s32 %s570_s16, %s725_s20 }
   0xa   : > { %p402_p6 = scmp.ge.s32.totalorder %s574_s17, 1  ;;  %p110_p7 = scmp.eq.s32.totalorder %s107_s23, 0 }
   0xb   : > { %p645_p8 = por %p129_p5, %p128_p3  ;;  %p172_p9 = scmp.lt.s32.totalorder %s574_s17, 3 }
   0xc   : > { %s651_s25 = scalar_select %p110_p7, %s562_s14, %s112_s21  }
   0xd   : > { %p173_p10 = pnand %p402_p6, %p172_p9 }
   0xe   : > { %p206_p11 = scmp.lt.s32.totalorder (!%p173_p10), %s566_s15, 1  ;;  %s202_s18 = sand.u32 (!%p173_p10), 1, %s558_s13  }
   0xf   : > { %176 = sbr.rel (%p173_p10) target bundleno = 176 (0xb0), region = 32  ;;  %s403_s19 = sshll.u32 (!%p173_p10), %s202_s18, 4 }
  0x10   : > { %s438_s26 = sshll.u32 (!%p173_p10), %s566_s15, 4 }
  0x11   : > { %s299_s29 = scalar_lea.hbm (!%p173_p10), %s716_s3, %s438_s26 }
  0x12   : > { %s302_s5 = sshll.u32 (!%p173_p10), %s299_s29, 4  ;;  %s303_s5 = int_to_ptr.hbm [resolvable:$true] %s302_s5 }
  0x13   : > { %s510_s8 = sshra.s32 (!%p173_p10), %s303_s5, 4  ;;  %s511_s8 = int_to_ptr.hbm [resolvable:$true] %s510_s8 }
  0x14   : > { %v437_v0 = vld [vmem:[%s714_s1 + $0x18] sm:$0xff]  ;;  %v436_v1 = vld [vmem:[%s714_s1 + $0x10] sm:$0xff]  ;;  %s207_s30 = scalar_select %p206_p11, %s566_s15, 1  ;;  %v435_v2 = vld [vmem:[%s714_s1 + $0x8] sm:$0xff]  ;;  %vm264_vm0 = vcmask 523264   ;;  %vm282_vm1 = vcmask 261120  }
  0x15   : > { %272 = vmatpush.bf16.msra.mxu0 %v437_v0  ;;  %v434_v3 = vld [vmem:[%s714_s1] sm:$0xff]  ;;  %v234_v8 = vld [vmem:[%s715_s2 + $0x8] sm:$0xff]  ;;  %s286_s15 = scalar_lea.sflag [#allocation3], %s202_s18  ;;  %s512_s9 = scalar_lea.hbm %s511_s8, 16 }
  0x16   : > { %s432_s6 = sshll.u32 %s207_s30, 3  ;;  %v233_v5 = vld [vmem:[%s715_s2] sm:$0xff]  ;;  %s204_s30 = scalar_lea.vmem [#allocation2], %s403_s19 }
  0x17   : > { %s213_s11 = scalar_lea.vmem %s713_s0, %s432_s6  ;;  %s300_s4 = sshll.u32 %s204_s30, 4  ;;  %s301_s4 = int_to_ptr.vmem [resolvable:$true] %s300_s4 }
  0x18   : > { %v433_v4 = vld [vmem:[%s213_s11] sm:$0xff]  ;;  %p513_p12 = scmp.ne.s32.totalorder %s511_s8, %s512_s9  ;;  %s516_s19 = scalar_lea.hbm %s716_s3, 32 }
  0x19   : > { %273 = vmatpush.bf16.msra.mxu0 %v436_v1  ;;  %p517_p1 = scmp.lt.s32.totalorder %s511_s8, %s716_s3  ;;  %p518_p2 = scmp.lt.s32.totalorder %s516_s19, %s512_s9 }
  0x1a   : > { %p514_p13 = pnand %p513_p12, %p638_p4 }
  0x1b   : > { %p519_p3 = por %p518_p2, %p517_p1 }
  0x1c   : > { %p515_p0 = pneg %p514_p13 }
  0x1d   : > { %274 = vmatpush.bf16.msra.mxu0 %v435_v2 }
  0x1e   : > { %p520_p5 = pnand %p519_p3, %p515_p0 }
  0x21   : > { %275 = vmatpush.bf16.msra.mxu0 %v434_v3 }
  0x24   : > { %426 = vmatmul.msk.bf16.vlgmr.msra.gmra.mxu0 %vm264_vm0, %v433_v4 }
  0xa1   : > { %v277_v6 = vpop.f32.mrf.mxu0 }
  0xa2   : > { %v278_v7 = vadd.f32 %v277_v6, %v233_v5 }
  0xa4   : > { %283 = vst.msk [vmem:[%s204_s30] sm:$0xff] %vm282_vm1, %v278_v7 }
  0xa9   : > { %v279_v9 = vpop.f32.mrf.mxu0 }
  0xaa   : > { %v280_v10 = vadd.f32 %v279_v9, %v234_v8 }
  0xac   : > { %284 = vst.msk [vmem:[%s204_s30 + $0x8] sm:$0xff] %vm282_vm1, %v280_v10 }
  0xad   : > { %523 = shalt.err (!%p520_p5)
}
  0xae   : > { %s576_s18 = smov 128   ;;  %s577_s26 = smov 8  }
  0xaf   : > { %439 = dma.vmem_to_hbm [thread:$0]  (%p638_p4), %s301_s4, 256, %s303_s5, %s286_s15, %s576_s18, %s576_s18, %s577_s26  }
  0xb0 PF: > { %p445_p6 = scmp.ge.s32.totalorder %s574_s17, 2  ;;  %s317_s27 = sand.u32 1, %s554_s12  }
  0xb1   : > { %s318_s28 = scalar_lea.sflag [#allocation3], %s317_s27 }
  0xb2   : > { %p442_p7 = pnand %p445_p6, %p645_p8 }
  0xb4   : > { %p443_p9 = pneg %p442_p7 }
  0xb6   : > { %549 = dma.done.wait (%p443_p9), %s318_s28, 256  }
  0xb7   : > { %551 = vsyncadd (%p443_p9), %s318_s28, 4294967040  ;;  %s16_s17 = sadd.s32 1, %s574_s17   ;;  %s719_s12 = smov %s558_s13 }
  0xb8   : > { %p13_p10 = scmp.ge.s32.totalorder %s16_s17, 4   ;;  %s720_s13 = smov %s562_s14 }
  0xb9   : > { %s721_s14 = smov %s651_s25  ;;  %s722_s15 = smov %s570_s16 }
  0xba   : > { %s723_s16 = smov %s725_s20  ;;  %15 = sbr.rel (!%p13_p10) target bundleno = 4 (0x4), region = 70 }
  0xbf   :  { %324 = vsyncpa [#allocation3], 1 }
  0xc0   :  { %326 = vsyncpa [#allocation3 + $0x1], 1 }

</bundles_post_ra>
